<compile_context>
chip_gen: v6e
topology: v6e:2x2x1
jax: 0.10.0
libtpu: 0.0.40
codegen_flags: <defaults>
</compile_context>

<pallas_src>
import functools
import math

import jax
import jax.numpy as jnp
from jax.experimental import pallas as pl
from jax.experimental.pallas import tpu as pltpu


def _round_up(x, m):
    return (x + m - 1) // m * m


def _default_tile_m():
    """Generation-aware row tile: 256 on v5e, 512 on v6e/v7x/unknown."""
    try:
        kind = jax.devices()[0].device_kind.lower()
    except Exception:
        return 512
    if "v5 lite" in kind or "v5e" in kind or "v5litepod" in kind:
        return 256
    return 512


def _mlp_head_kernel(x_ref, w1_ref, b1_ref, w2_ref, b2_ref, o_ref, *,
                     approximate_gelu: bool):
    # x_ref:  (TM, Hp)    input rows (original dtype; cast to bf16 here)
    # w1_ref: (Hp, Hhp)   bf16 linear1 weight (in x out), resident
    # b1_ref: (1, Hhp)    f32 linear1 bias
    # w2_ref: (Hhp, Ep)   bf16 linear2 weight (in x out), resident
    # b2_ref: (1, Ep)     f32 linear2 bias
    # o_ref:  (TM, Ep)    output block in x.dtype (lane-dense: Ep % 128 == 0)

    x = x_ref[...].astype(jnp.bfloat16)

    # linear1: bf16 MXU operands, f32 accumulation, f32 bias add
    h = jnp.dot(x, w1_ref[...], preferred_element_type=jnp.float32)
    h = h + b1_ref[...]

    if approximate_gelu:
        # tanh approximation -> EUP slot (VALU relief on v5e). Slightly
        # different numerics vs torch.nn.GELU() default (erf).
        c = jnp.float32(math.sqrt(2.0 / math.pi))
        h = 0.5 * h * (1.0 + jnp.tanh(c * (h + jnp.float32(0.044715) * h * h * h)))
    else:
        # exact (erf-based) GELU in f32 — matches torch.nn.GELU() default
        h = 0.5 * h * (1.0 + jax.lax.erf(h * jnp.float32(1.0 / math.sqrt(2.0))))

    # linear2: cast activation back to bf16 for the MXU, accumulate in f32
    y = jnp.dot(h.astype(jnp.bfloat16), w2_ref[...],
                preferred_element_type=jnp.float32)
    y = y + b2_ref[...]

    # Dropout: eval mode => identity.
    o_ref[...] = y.astype(o_ref.dtype)


def instruction_trace_embedding_head(x, w1, b1, w2, b2, *, tile_m=None,
                                     approximate_gelu=False):
    """x: (B, S, H). w1: (H, H//2), b1: (H//2,), w2: (H//2, E), b2: (E,).

    Weights are expected in (in, out) layout (torch nn.Linear weight
    transposed).  Returns (B, S, E) in x.dtype.
    """
    B, S, H = x.shape
    Hh = w1.shape[1]          # hidden_size // 2
    E = w2.shape[1]           # embedding_size
    N = B * S
    out_dtype = x.dtype
    x_isz = jnp.dtype(x.dtype).itemsize
    o_isz = jnp.dtype(out_dtype).itemsize

    if tile_m is None:
        tile_m = _default_tile_m()

    # Lane-dense padding of feature dims; row padding to the row tile.
    Hp = _round_up(H, 128)
    Hhp = _round_up(Hh, 128)
    Ep = _round_up(E, 128)

    # Row tile: multiple of 16 (bf16 sublane packing); clamp for tiny inputs.
    tm = min(tile_m, _round_up(N, 16))
    # Keep >= 2 grid steps when there is enough work so the "parallel" axis
    # can shard across the v7x megacore's two TensorCores.
    if N > 256 and N <= tm:
        tm = _round_up(-(-N // 2), 16)
    Np = _round_up(N, tm)
    grid = (Np // tm,)

    # Input rows: keep the original dtype (kernel casts to bf16); only pad
    # when misaligned so aligned shapes incur zero extra wrapper HBM passes.
    x_flat = x.reshape(N, H)
    if Np != N or Hp != H:
        x_in = jnp.pad(x_flat, ((0, Np - N), (0, Hp - H)))
    else:
        x_in = x_flat

    def _pad2(a, r, c):
        if a.shape == (r, c):
            return a
        return jnp.pad(a, ((0, r - a.shape[0]), (0, c - a.shape[1])))

    w1_p = _pad2(w1.astype(jnp.bfloat16), Hp, Hhp)
    w2_p = _pad2(w2.astype(jnp.bfloat16), Hhp, Ep)
    b1_p = _pad2(b1.astype(jnp.float32).reshape(1, -1), 1, Hhp)
    b2_p = _pad2(b2.astype(jnp.float32).reshape(1, -1), 1, Ep)

    # Advisory cost estimate for XLA's scheduler.
    cost = pl.CostEstimate(
        flops=2 * Np * Hp * Hhp + 2 * Np * Hhp * Ep,
        transcendentals=Np * Hhp,
        bytes_accessed=(Np * Hp * x_isz + Hp * Hhp * 2 + Hhp * Ep * 2
                        + Hhp * 4 + Ep * 4 + Np * Ep * o_isz),
    )

    # Tight VMEM budget: double-buffered x/out tiles, single-buffered resident
    # weights/biases, + Mosaic scratch headroom; capped at 48 MiB (v7x safety).
    vmem_need = (2 * tm * Hp * x_isz            # x tiles (double-buffered)
                 + 2 * tm * Ep * o_isz          # out tiles (double-buffered)
                 + Hp * Hhp * 2 + Hhp * Ep * 2  # weights (Buffered(1), bf16)
                 + Hhp * 4 + Ep * 4             # biases (f32)
                 + (4 << 20))                   # headroom
    vmem_bytes = int(min(vmem_need, 48 << 20))

    kernel = functools.partial(_mlp_head_kernel,
                               approximate_gelu=approximate_gelu)

    resident = pl.Buffered(1)   # constant index_map => no double-buffering
    out_pad = pl.pallas_call(
        kernel,
        out_shape=jax.ShapeDtypeStruct((Np, Ep), out_dtype),
        grid_spec=pltpu.PrefetchScalarGridSpec(
            num_scalar_prefetch=0,
            grid=grid,
            in_specs=[
                pl.BlockSpec((tm, Hp), lambda i: (i, 0)),        # x rows
                pl.BlockSpec((Hp, Hhp), lambda i: (0, 0),
                             pipeline_mode=resident),            # w1
                pl.BlockSpec((1, Hhp), lambda i: (0, 0),
                             pipeline_mode=resident),            # b1
                pl.BlockSpec((Hhp, Ep), lambda i: (0, 0),
                             pipeline_mode=resident),            # w2
                pl.BlockSpec((1, Ep), lambda i: (0, 0),
                             pipeline_mode=resident),            # b2
            ],
            out_specs=pl.BlockSpec((tm, Ep), lambda i: (i, 0)),
        ),
        compiler_params=pltpu.CompilerParams(
            dimension_semantics=("parallel",),
            vmem_limit_bytes=vmem_bytes,
        ),
        cost_estimate=cost,
    )(x_in, w1_p, b1_p, w2_p, b2_p)

    # Only slice when padding was actually applied.
    if Np != N or Ep != E:
        out = out_pad[:N, :E]
    else:
        out = out_pad
    return out.reshape(B, S, E)


def _reference(x, w1, b1, w2, b2):
    """Mirrors the kernel's numerics: bf16 matmul operands, f32 accumulation,
    exact erf GELU in f32."""
    hp = jax.lax.Precision.HIGHEST
    xb = x.astype(jnp.bfloat16).astype(jnp.float32)
    w1b = w1.astype(jnp.bfloat16).astype(jnp.float32)
    w2b = w2.astype(jnp.bfloat16).astype(jnp.float32)
    h = jnp.dot(xb, w1b, precision=hp) + b1
    h = 0.5 * h * (1.0 + jax.lax.erf(h / jnp.sqrt(2.0)))
    hb = h.astype(jnp.bfloat16).astype(jnp.float32)
    return jnp.dot(hb, w2b, precision=hp) + b2


if __name__ == "__main__":
    # Small config consistent with the module:
    #   hidden_size=32, embedding_size=16, batch=2, seq=8
    B, S, H, E = 2, 8, 32, 16
    Hh = H // 2

    key = jax.random.PRNGKey(0)
    kx, kw1, kb1, kw2, kb2 = jax.random.split(key, 5)

    x = jax.random.normal(kx, (B, S, H), dtype=jnp.float32)
    # nn.Linear stores weight as (out, in); here weights are pre-transposed
    # to (in, out) for row-major matmul.
    w1 = jax.random.normal(kw1, (H, Hh), dtype=jnp.float32) * 0.05
    b1 = jax.random.normal(kb1, (Hh,), dtype=jnp.float32) * 0.05
    w2 = jax.random.normal(kw2, (Hh, E), dtype=jnp.float32) * 0.05
    b2 = jax.random.normal(kb2, (E,), dtype=jnp.float32) * 0.05

    out = instruction_trace_embedding_head(x, w1, b1, w2, b2)
    out = jax.block_until_ready(out)

    ref = _reference(x.reshape(-1, H), w1, b1, w2, b2).reshape(B, S, E)
    assert out.shape == (B, S, E)
    assert out.dtype == x.dtype
    max_err = float(jnp.max(jnp.abs(out.astype(jnp.float32) - ref)))
    assert max_err < 1e-4, f"mismatch vs reference: max abs err {max_err}"

    print("KERNEL_OK")
</pallas_src>

<mosaic_0001>
module attributes {stable_mosaic.version = 11 : i64} {
  func.func @_mlp_head_kernel(%arg0: i32, %arg1: memref<16x128xf32, #tpu.memory_space<vmem>>, %arg2: memref<128x128xbf16, #tpu.memory_space<vmem>>, %arg3: memref<1x128xf32, #tpu.memory_space<vmem>>, %arg4: memref<128x128xbf16, #tpu.memory_space<vmem>>, %arg5: memref<1x128xf32, #tpu.memory_space<vmem>>, %arg6: memref<16x128xf32, #tpu.memory_space<vmem>>) attributes {dimension_semantics = [#tpu.dimension_semantics<parallel>], iteration_bounds = array<i64: 1>, scalar_prefetch = 0 : i64, scratch_operands = 0 : i64, tpu.core_type = #tpu.core_type<tc>, window_params = [{transform_indices = @transform_0, window_bounds = array<i64: 16, 128>}, {pipeline_mode = #tpu.pipeline_mode<synchronous>, transform_indices = @transform_1, window_bounds = array<i64: 128, 128>}, {pipeline_mode = #tpu.pipeline_mode<synchronous>, transform_indices = @transform_2, window_bounds = array<i64: 1, 128>}, {pipeline_mode = #tpu.pipeline_mode<synchronous>, transform_indices = @transform_3, window_bounds = array<i64: 128, 128>}, {pipeline_mode = #tpu.pipeline_mode<synchronous>, transform_indices = @transform_4, window_bounds = array<i64: 1, 128>}, {transform_indices = @transform_5, window_bounds = array<i64: 16, 128>}]} {
    %c0 = arith.constant 0 : index
    %c0_0 = arith.constant 0 : index
    %0 = vector.load %arg1[%c0, %c0_0] : memref<16x128xf32, #tpu.memory_space<vmem>>, vector<16x128xf32>
    %1 = arith.truncf %0 : vector<16x128xf32> to vector<16x128xbf16>
    %c0_1 = arith.constant 0 : index
    %c0_2 = arith.constant 0 : index
    %2 = vector.load %arg2[%c0_1, %c0_2] : memref<128x128xbf16, #tpu.memory_space<vmem>>, vector<128x128xbf16>
    %cst = arith.constant dense<0.000000e+00> : vector<16x128xf32>
    %3 = tpu.matmul %1, %2, %cst {dimension_numbers = #tpu.dot_dimension_numbers<[1], [0], [0], [1], [0, 0, 1, 1], [], []>} : vector<16x128xbf16>, vector<128x128xbf16>, vector<16x128xf32> -> vector<16x128xf32>
    %c0_3 = arith.constant 0 : index
    %c0_4 = arith.constant 0 : index
    %4 = vector.load %arg3[%c0_3, %c0_4] : memref<1x128xf32, #tpu.memory_space<vmem>>, vector<1x128xf32>
    %5 = vector.broadcast %4 : vector<1x128xf32> to vector<16x128xf32>
    %6 = arith.addf %3, %5 : vector<16x128xf32>
    %cst_5 = arith.constant 5.000000e-01 : f32
    %7 = vector.broadcast %cst_5 : f32 to vector<16x128xf32>
    %8 = arith.mulf %7, %6 : vector<16x128xf32>
    %cst_6 = arith.constant 0.707106769 : f32
    %9 = vector.broadcast %cst_6 : f32 to vector<16x128xf32>
    %10 = arith.mulf %6, %9 : vector<16x128xf32>
    %11 = math.erf %10 : vector<16x128xf32>
    %cst_7 = arith.constant 1.000000e+00 : f32
    %12 = vector.broadcast %cst_7 : f32 to vector<16x128xf32>
    %13 = arith.addf %12, %11 : vector<16x128xf32>
    %14 = arith.mulf %8, %13 : vector<16x128xf32>
    %15 = arith.truncf %14 : vector<16x128xf32> to vector<16x128xbf16>
    %c0_8 = arith.constant 0 : index
    %c0_9 = arith.constant 0 : index
    %16 = vector.load %arg4[%c0_8, %c0_9] : memref<128x128xbf16, #tpu.memory_space<vmem>>, vector<128x128xbf16>
    %cst_10 = arith.constant dense<0.000000e+00> : vector<16x128xf32>
    %17 = tpu.matmul %15, %16, %cst_10 {dimension_numbers = #tpu.dot_dimension_numbers<[1], [0], [0], [1], [0, 0, 1, 1], [], []>} : vector<16x128xbf16>, vector<128x128xbf16>, vector<16x128xf32> -> vector<16x128xf32>
    %c0_11 = arith.constant 0 : index
    %c0_12 = arith.constant 0 : index
    %18 = vector.load %arg5[%c0_11, %c0_12] : memref<1x128xf32, #tpu.memory_space<vmem>>, vector<1x128xf32>
    %19 = vector.broadcast %18 : vector<1x128xf32> to vector<16x128xf32>
    %20 = arith.addf %17, %19 : vector<16x128xf32>
    %c0_13 = arith.constant 0 : index
    %c0_14 = arith.constant 0 : index
    %21 = vector.load %arg6[%c0_13, %c0_14] : memref<16x128xf32, #tpu.memory_space<vmem>>, vector<16x128xf32>
    tpu.vector_store %arg6[%c0_13, %c0_14], %20 {strides = array<i32>} : memref<16x128xf32, #tpu.memory_space<vmem>>, vector<16x128xf32>,
    return
  }
  func.func @transform_0(%arg0: i32) -> (i32, i32) {
    %c0_i32 = arith.constant 0 : i32
    %c0_i32_0 = arith.constant 0 : i32
    return %arg0, %c0_i32 : i32, i32
  }
  func.func @transform_1(%arg0: i32) -> (i32, i32) {
    %c0_i32 = arith.constant 0 : i32
    %c0_i32_0 = arith.constant 0 : i32
    %c0_i32_1 = arith.constant 0 : i32
    return %c0_i32, %c0_i32_0 : i32, i32
  }
  func.func @transform_2(%arg0: i32) -> (i32, i32) {
    %c0_i32 = arith.constant 0 : i32
    %c0_i32_0 = arith.constant 0 : i32
    %c0_i32_1 = arith.constant 0 : i32
    return %c0_i32, %c0_i32_0 : i32, i32
  }
  func.func @transform_3(%arg0: i32) -> (i32, i32) {
    %c0_i32 = arith.constant 0 : i32
    %c0_i32_0 = arith.constant 0 : i32
    %c0_i32_1 = arith.constant 0 : i32
    return %c0_i32, %c0_i32_0 : i32, i32
  }
  func.func @transform_4(%arg0: i32) -> (i32, i32) {
    %c0_i32 = arith.constant 0 : i32
    %c0_i32_0 = arith.constant 0 : i32
    %c0_i32_1 = arith.constant 0 : i32
    return %c0_i32, %c0_i32_0 : i32, i32
  }
  func.func @transform_5(%arg0: i32) -> (i32, i32) {
    %c0_i32 = arith.constant 0 : i32
    %c0_i32_0 = arith.constant 0 : i32
    return %arg0, %c0_i32 : i32, i32
  }
}

</mosaic_0001>

<bundles_post_ra>
// kernel: tpu_custom_call.1
= control target key start
LH: loop header
LB: loop body
LE: loop exit
PB: predicated region body
PF: predicated region fallthrough
CT: control target
= control target key end

     0   :  { %10 = vsyncpa [#allocation3], 0  ;;  %s577_s0 = inlined_call_operand.hbm [shape: f32[16,128], index: 0, kind: input, shape index: {}]   ;;  %s578_s1 = inlined_call_operand.hbm [shape: bf16[128,128], index: 1, kind: input, shape index: {}]   ;;  %s579_s2 = inlined_call_operand.vmem [shape: f32[1,128], index: 2, kind: input, shape index: {}]   ;;  %s580_s3 = inlined_call_operand.hbm [shape: bf16[128,128], index: 3, kind: input, shape index: {}]   ;;  %s581_s4 = inlined_call_operand.vmem [shape: f32[1,128], index: 4, kind: input, shape index: {}]   ;;  %s582_s5 = inlined_call_operand.hbm [shape: f32[16,128], index: 5, kind: output, shape index: {}]  }
   0x1   :  { %11 = vsyncpa [#allocation6], 0 }
   0x2   :  { %12 = vsyncpa [#allocation4], 0  ;;  %s513_s18 = smov [#allocation5]  }
   0x3   :  { %s30_s19 = sshll.u32 %s513_s18, 4  ;;  %s31_s19 = int_to_ptr.vmem [resolvable:$true] %s30_s19 }
   0x4   :  { %s435_s20 = scalar_lea.vmem %s31_s19, 1024  ;;  %p440_p1 = scmp.lt.s32.totalorder %s31_s19, %s31_s19 }
   0x5   :  { %p436_p0 = scmp.ne.s32.totalorder %s31_s19, %s435_s20  ;;  %p441_p2 = scmp.lt.s32.totalorder %s435_s20, %s435_s20 }
   0x7   :  { %p442_p3 = por %p441_p2, %p440_p1 }
   0x9   :  { %p443_p4 = pnand %p442_p3, %p436_p0 }
   0xb   :  { %446 = shalt.err (!%p443_p4)
}
   0xc   :  { %s514_s21 = smov 64   ;;  %s515_s22 = smov 4  }
   0xd   :  { %36 = dma.hbm_to_vmem [thread:$0]  %s578_s1, 1024, %s31_s19, [#allocation6], %s514_s21, %s514_s21, %s515_s22  }
   0xe   :  { %s516_s25 = smov [#allocation2]  }
   0xf   :  { %s18_s26 = sshll.u32 %s516_s25, 4  ;;  %s19_s26 = int_to_ptr.vmem [resolvable:$true] %s18_s26 }
  0x10   :  { %s455_s27 = scalar_lea.vmem %s19_s26, 256  ;;  %p460_p6 = scmp.lt.s32.totalorder %s19_s26, %s19_s26 }
  0x11   :  { %p456_p5 = scmp.ne.s32.totalorder %s19_s26, %s455_s27  ;;  %p461_p7 = scmp.lt.s32.totalorder %s455_s27, %s455_s27 }
  0x13   :  { %p462_p8 = por %p461_p7, %p460_p6 }
  0x15   :  { %p463_p9 = pnand %p462_p8, %p456_p5 }
  0x17   :  { %466 = shalt.err (!%p463_p9)
}
  0x18   :  { %s517_s28 = smov 128   ;;  %s518_s29 = smov 8  }
  0x19   :  { %24 = dma.hbm_to_vmem [thread:$0]  %s577_s0, 256, %s19_s26, [#allocation3], %s517_s28, %s517_s28, %s518_s29  }
  0x1a   :  { %s519_s1 = smov [#allocation7]  }
  0x1b   :  { %s44_s7 = sshll.u32 %s519_s1, 4  ;;  %s45_s7 = int_to_ptr.vmem [resolvable:$true] %s44_s7 }
  0x1c   :  { %s475_s8 = scalar_lea.vmem %s45_s7, 1024  ;;  %p480_p11 = scmp.lt.s32.totalorder %s45_s7, %s45_s7 }
  0x1d   :  { %p476_p10 = scmp.ne.s32.totalorder %s45_s7, %s475_s8  ;;  %p481_p12 = scmp.lt.s32.totalorder %s475_s8, %s475_s8 }
  0x1f   :  { %p482_p13 = por %p481_p12, %p480_p11 }
  0x21   :  { %p483_p0 = pnand %p482_p13, %p476_p10 }
  0x23   :  { %486 = shalt.err (!%p483_p0)
}
  0x24   :  { %50 = dma.hbm_to_vmem [thread:$0]  %s580_s3, 1024, %s45_s7, [#allocation6], %s514_s21, %s514_s21, %s515_s22  }
  0x25   :  { %507 = dma.done.wait [#allocation3], 256  }
  0x26   :  { %508 = vsyncadd [#allocation3], 4294967040 }
  0x27   :  { %509 = dma.done.wait [#allocation6], 2048  }
  0x28   :  { %510 = vsyncadd [#allocation6], 4294965248  ;;  %v520_v0 = vmov 0.0   ;;  %vm521_vm0 = vmmov 0   ;;  %v407_v1 = vld [vmem:[#allocation5 + $0x38] sm:$0xff]   ;;  %v408_v2 = vld [vmem:[#allocation5 + $0x30] sm:$0xff]  }
  0x29   :  { %357 = vmatprep.subr.bf16.mxu0 %v520_v0  ;;  %373 = vmatprep.mubr.msk.bf16.mxu0 %vm521_vm0, %v520_v0  ;;  %v409_v3 = vld [vmem:[#allocation5 + $0x28] sm:$0xff]   ;;  %v410_v4 = vld [vmem:[#allocation5 + $0x20] sm:$0xff]   ;;  %v415_v5 = vld [vmem:[#allocation7 + $0x38] sm:$0xff]   ;;  %s522_s12 = smov [#allocation8]  }
  0x2a   :  { %377 = vmatprep.subr.bf16.mxu1 %v520_v0  ;;  %393 = vmatprep.mubr.msk.bf16.mxu1 %vm521_vm0, %v520_v0  ;;  %v411_v6 = vld [vmem:[#allocation5 + $0x18] sm:$0xff]   ;;  %v412_v7 = vld [vmem:[#allocation5 + $0x10] sm:$0xff]   ;;  %v413_v8 = vld [vmem:[#allocation5 + $0x8] sm:$0xff]   ;;  %s308_s13 = sshll.u32 %s522_s12, 4  ;;  %s309_s13 = int_to_ptr.vmem [resolvable:$true] %s308_s13 }
  0x2b   :  { %358 = vmatpush3.bf16.msra.mxu0 %v407_v1  ;;  %378 = vmatpush3.bf16.msra.mxu1 %v415_v5  ;;  %v414_v9 = vld [vmem:[#allocation5] sm:$0xff]   ;;  %v63_v10 = vld [vmem:[#allocation2] sm:$0xff]  ;;  %v64_v11 = vld [vmem:[#allocation2 + $0x8] sm:$0xff]  ;;  %s487_s14 = scalar_lea.vmem %s309_s13, 256  ;;  %p492_p2 = scmp.lt.s32.totalorder %s309_s13, %s309_s13 }
  0x2c   :  { %359 = vmatprep.subr.bf16.mxu0 %v520_v0  ;;  %379 = vmatprep.subr.bf16.mxu1 %v520_v0  ;;  %v65_v12 = vpack.c.bf16 %v64_v11, %v63_v10  ;;  %v416_v13 = vld [vmem:[#allocation7 + $0x30] sm:$0xff]   ;;  %v417_v14 = vld [vmem:[#allocation7 + $0x28] sm:$0xff]   ;;  %v418_v15 = vld [vmem:[#allocation7 + $0x20] sm:$0xff]   ;;  %p488_p1 = scmp.ne.s32.totalorder %s309_s13, %s487_s14  ;;  %p493_p3 = scmp.lt.s32.totalorder %s487_s14, %s487_s14 }
  0x2d   :  { %v419_v16 = vld [vmem:[#allocation7 + $0x18] sm:$0xff]   ;;  %v420_v17 = vld [vmem:[#allocation7 + $0x10] sm:$0xff]   ;;  %v421_v18 = vld [vmem:[#allocation7 + $0x8] sm:$0xff]  }
  0x2e   :  { %v422_v19 = vld [vmem:[#allocation7] sm:$0xff]   ;;  %v321_v20 = vld [vmem:[%s579_s2] ss:$0 sm:$0xff]  ;;  %p494_p4 = por %p493_p3, %p492_p2 }
  0x2f   :  { %360 = vmatpush3.bf16.msra.mxu0 %v408_v2  ;;  %380 = vmatpush3.bf16.msra.mxu1 %v416_v13  ;;  %v330_v38 = vld [vmem:[%s581_s4] ss:$0 sm:$0xff] }
  0x30   :  { %361 = vmatprep.subr.bf16.mxu0 %v520_v0  ;;  %381 = vmatprep.subr.bf16.mxu1 %v520_v0  ;;  %p495_p5 = pnand %p494_p4, %p488_p1 }
  0x33   :  { %362 = vmatpush3.bf16.msra.mxu0 %v409_v3  ;;  %382 = vmatpush3.bf16.msra.mxu1 %v417_v14 }
  0x34   :  { %363 = vmatprep.subr.bf16.mxu0 %v520_v0  ;;  %383 = vmatprep.subr.bf16.mxu1 %v520_v0 }
  0x37   :  { %364 = vmatpush3.bf16.msra.mxu0 %v410_v4  ;;  %384 = vmatpush3.bf16.msra.mxu1 %v418_v15 }
  0x38   :  { %365 = vmatprep.subr.bf16.mxu0 %v520_v0  ;;  %385 = vmatprep.subr.bf16.mxu1 %v520_v0 }
  0x3b   :  { %366 = vmatpush3.bf16.msra.mxu0 %v411_v6  ;;  %386 = vmatpush3.bf16.msra.mxu1 %v419_v16 }
  0x3c   :  { %367 = vmatprep.subr.bf16.mxu0 %v520_v0  ;;  %387 = vmatprep.subr.bf16.mxu1 %v520_v0 }
  0x3f   :  { %368 = vmatpush3.bf16.msra.mxu0 %v412_v7  ;;  %388 = vmatpush3.bf16.msra.mxu1 %v420_v17 }
  0x40   :  { %369 = vmatprep.subr.bf16.mxu0 %v520_v0  ;;  %389 = vmatprep.subr.bf16.mxu1 %v520_v0 }
  0x43   :  { %370 = vmatpush3.bf16.msra.mxu0 %v413_v8  ;;  %390 = vmatpush3.bf16.msra.mxu1 %v421_v18 }
  0x44   :  { %371 = vmatprep.subr.bf16.mxu0 %v520_v0  ;;  %391 = vmatprep.subr.bf16.mxu1 %v520_v0 }
  0x47   :  { %372 = vmatpush3.bf16.msra.mxu0 %v414_v9  ;;  %392 = vmatpush3.bf16.msra.mxu1 %v422_v19 }
  0x4a   :  { %374 = vmatmul.mubr.bf16.vlgmr.msra.gmra.mxu0 %v65_v12 }
 0x10a   :  { %v171_v21 = vpop.f32.mrf.mxu0 }
 0x10b   :  { %v172_v22 = vadd.f32 %v321_v20, %v171_v21 }
 0x10c   :  { %v375_v23 = vpop.f32.mrf.mxu0 }
 0x10d   :  { %v180_v24 = vmul.f32 0.70710677, %v172_v22  ;;  %v178_v32 = vmul.f32 0.5, %v172_v22 }
 0x10e   :  { %v174_v25 = vpop.f32.mrf.mxu0 }
 0x10f   :  { %423 = verf.f32 %v180_v24  ;;  %v175_v26 = vadd.f32 %v321_v20, %v174_v25 }
 0x110   :  { %v376_v27 = vpop.f32.mrf.mxu0 }
 0x111   :  { %v181_v28 = vmul.f32 0.70710677, %v175_v26  ;;  %v179_v33 = vmul.f32 0.5, %v175_v26 }
 0x113   :  { %425 = verf.f32 %v181_v28 }
 0x11c   :  { %v424_v29 = vpop.eup %423 }
 0x11d   :  { %v184_v30 = vadd.f32 1.0, %v424_v29 }
 0x11f   :  { %v186_v35 = vmul.f32 %v184_v30, %v178_v32 }
 0x120   :  { %v426_v31 = vpop.eup %425 }
 0x121   :  { %v185_v34 = vadd.f32 1.0, %v426_v31 }
 0x123   :  { %v187_v36 = vmul.f32 %v185_v34, %v179_v33 }
 0x125   :  { %v188_v37 = vpack.c.bf16 %v187_v36, %v186_v35 }
 0x127   :  { %394 = vmatmul.mubr.bf16.vlgmr.msra.gmra.mxu1 %v188_v37 }
 0x1e7   :  { %v294_v39 = vpop.f32.mrf.mxu1 }
 0x1e8   :  { %v295_v40 = vadd.f32 %v330_v38, %v294_v39 }
 0x1e9   :  { %v395_v41 = vpop.f32.mrf.mxu1 }
 0x1ea   :  { %301 = vst [vmem:[#allocation8] sm:$0xff] %v295_v40 }
 0x1eb   :  { %v297_v42 = vpop.f32.mrf.mxu1 }
 0x1ec   :  { %v298_v43 = vadd.f32 %v330_v38, %v297_v42 }
 0x1ed   :  { %v396_v44 = vpop.f32.mrf.mxu1 }
 0x1ee   :  { %302 = vst [vmem:[#allocation8 + $0x8] sm:$0xff] %v298_v43 }
 0x1ef   :  { %498 = shalt.err (!%p495_p5)
}
 0x1f0   :  { %314 = dma.vmem_to_hbm [thread:$0]  %s309_s13, 256, %s582_s5, [#allocation4], %s517_s28, %s517_s28, %s518_s29  }
 0x1f1   :  { %511 = dma.done.wait [#allocation4], 256  }
 0x1f2   :  { %512 = vsyncadd [#allocation4], 4294967040 }
 0x1f3   :  { %318 = vsyncpa [#allocation3], 1 }
 0x1f4   :  { %319 = vsyncpa [#allocation6], 1 }
 0x1f5   :  { %320 = vsyncpa [#allocation4], 1 }

</bundles_post_ra>
